<compile_context>
chip_gen: v7x
topology: tpu7x:2x2x1
jax: 0.10.0
libtpu: 0.0.40
codegen_flags: <defaults>
</compile_context>

<pallas_src>
import functools

import jax
import jax.numpy as jnp
from jax.experimental import pallas as pl
from jax.experimental.pallas import tpu as pltpu

NUM_GROUPS = 32
GN_EPS = 1e-6


def _round_up(x, m):
    return ((x + m - 1) // m) * m


def _detect_vmem_capacity():
    try:
        cap = int(pltpu.get_tpu_info().vmem_capacity_bytes)
        if cap <= 0:
            raise ValueError
        return cap
    except Exception:
        # conservative fallback that is safe on v5e/v6e (128 MiB) and v7x (64 MiB)
        return 64 * 1024 * 1024


VMEM_CAP = _detect_vmem_capacity()
VMEM_LIMIT = int(min(VMEM_CAP * 4 // 5, 100 * 1024 * 1024))
CONV_VMEM_BUDGET = VMEM_LIMIT // 2
GN_VMEM_BUDGET = VMEM_LIMIT // 3


# ----------------------------------------------------------------------------
# Pallas kernels
# ----------------------------------------------------------------------------
def _matmul_bias_kernel(x_ref, w_ref, b_ref, o_ref):
    acc = jnp.dot(x_ref[...], w_ref[...], preferred_element_type=jnp.float32)
    o_ref[...] = (acc + b_ref[...]).astype(o_ref.dtype)


def _conv3x3_kernel(xb_ref, h0_ref, h1_ref, w_ref, b_ref, o_ref):
    # xb: (1, TH, W+2, Cin)   rows [r*TH, r*TH+TH) of the zero-padded input
    # h0/h1: (1, 1, W+2, Cin) halo rows r*TH+TH and r*TH+TH+1
    # w: (3, 3, Cin, Cout) bf16 ; b: (1, Cout) f32 ; o: (1, TH, W, Cout) bf16
    th, w_out, cout = o_ref.shape[1], o_ref.shape[2], o_ref.shape[3]
    cin = w_ref.shape[2]
    x_all = jnp.concatenate([xb_ref[0], h0_ref[0], h1_ref[0]], axis=0)  # (TH+2, W+2, Cin)
    acc = jnp.zeros((th * w_out, cout), jnp.float32)
    for dy in range(3):
        x_dy = x_all[dy:dy + th]                              # (TH, W+2, Cin)
        for dx in range(3):
            a = x_dy[:, dx:dx + w_out, :].reshape(th * w_out, cin)
            acc = acc + jnp.dot(a, w_ref[dy, dx], preferred_element_type=jnp.float32)
    out = acc + b_ref[...]
    o_ref[...] = out.astype(o_ref.dtype).reshape(1, th, w_out, cout)


def _gn_stats_kernel(x_ref, o_ref):
    # x: (1, TS, C) bf16 ; o: (1, 2, C) f32  (accumulated over the TS grid axis)
    s = pl.program_id(1)
    xf = x_ref[0].astype(jnp.float32)
    s1 = jnp.sum(xf, axis=0, keepdims=True)
    s2 = jnp.sum(xf * xf, axis=0, keepdims=True)
    part = jnp.concatenate([s1, s2], axis=0)                  # (2, C)

    @pl.when(s == 0)
    def _init():
        o_ref[0] = part

    @pl.when(s != 0)
    def _acc():
        o_ref[0] = o_ref[0] + part


def _gn_apply_kernel(x_ref, sc_ref, sh_ref, o_ref, *, apply_swish):
    # x: (1, TS, C) bf16 ; sc/sh: (1, 1, C) f32 per-channel scale/shift
    x = x_ref[0].astype(jnp.float32)
    y = x * sc_ref[0] + sh_ref[0]
    if apply_swish:
        y = y * jax.nn.sigmoid(y)
    o_ref[0] = y.astype(o_ref.dtype)


def _attn_kernel(qkv_ref, o_ref):
    # qkv: (1, T, 3C) bf16 ; o: (1, T, C) bf16
    c = o_ref.shape[2]
    qkv = qkv_ref[0]
    q = qkv[:, :c]
    k = qkv[:, c:2 * c]
    v = qkv[:, 2 * c:3 * c]
    s = jax.lax.dot_general(q, k, (((1,), (1,)), ((), ())),
                            preferred_element_type=jnp.float32)
    s = s * (float(c) ** -0.5)
    s = s - jnp.max(s, axis=1, keepdims=True)
    p = jnp.exp(s)
    p = p * pl.reciprocal(jnp.sum(p, axis=1, keepdims=True), approx=True)
    o_ref[0] = jnp.dot(p.astype(v.dtype), v,
                       preferred_element_type=jnp.float32).astype(o_ref.dtype)


def _codebook_kernel(z_ref, e_ref, zq_ref, idx_ref, loss_ref):
    z = z_ref[...].astype(jnp.float32)        # (M, D)
    e = e_ref[...]                            # (K, D) f32
    z2 = jnp.sum(z * z, axis=1, keepdims=True)
    e2 = jnp.sum(e * e, axis=1)[None, :]
    ze = jax.lax.dot_general(z, e, (((1,), (1,)), ((), ())),
                             preferred_element_type=jnp.float32)
    dists = z2 + e2 - 2.0 * ze                # (M, K)
    min_d = jnp.min(dists, axis=1, keepdims=True)
    iota = jax.lax.broadcasted_iota(jnp.int32, dists.shape, 1)
    idx = jnp.min(jnp.where(dists <= min_d, iota, jnp.int32(dists.shape[1])),
                  axis=1, keepdims=True)      # first argmin, (M, 1)
    onehot = (iota == idx).astype(jnp.float32)
    zq = jnp.dot(onehot, e, preferred_element_type=jnp.float32)
    zq_ref[...] = zq.astype(zq_ref.dtype)
    idx_ref[...] = idx
    loss_ref[...] = jnp.sum(jnp.square(z - zq))[None, None]


# ----------------------------------------------------------------------------
# Cached pallas_call builders (one Mosaic compile per distinct shape/config)
# ----------------------------------------------------------------------------
@functools.lru_cache(maxsize=None)
def _matmul_bias_call(mp, k, n, tm):
    return jax.jit(pl.pallas_call(
        _matmul_bias_kernel,
        out_shape=jax.ShapeDtypeStruct((mp, n), jnp.bfloat16),
        grid=(mp // tm,),
        in_specs=[pl.BlockSpec((tm, k), lambda i: (i, 0)),
                  pl.BlockSpec((k, n), lambda i: (0, 0)),
                  pl.BlockSpec((1, n), lambda i: (0, 0))],
        out_specs=pl.BlockSpec((tm, n), lambda i: (i, 0)),
        compiler_params=pltpu.CompilerParams(
            dimension_semantics=("parallel",), vmem_limit_bytes=VMEM_LIMIT)))


@functools.lru_cache(maxsize=None)
def _conv3x3_call(n, h, wd, cin, cout, th):
    body = pl.BlockSpec((1, th, wd + 2, cin), lambda bn, r: (bn, r, 0, 0))
    halo0 = pl.BlockSpec((1, 1, wd + 2, cin), lambda bn, r: (bn, r * th + th, 0, 0))
    halo1 = pl.BlockSpec((1, 1, wd + 2, cin), lambda bn, r: (bn, r * th + th + 1, 0, 0))
    return jax.jit(pl.pallas_call(
        _conv3x3_kernel,
        out_shape=jax.ShapeDtypeStruct((n, h, wd, cout), jnp.bfloat16),
        grid=(n, h // th),
        in_specs=[body, halo0, halo1,
                  pl.BlockSpec((3, 3, cin, cout), lambda bn, r: (0, 0, 0, 0)),
                  pl.BlockSpec((1, cout), lambda bn, r: (0, 0))],
        out_specs=pl.BlockSpec((1, th, wd, cout), lambda bn, r: (bn, r, 0, 0)),
        compiler_params=pltpu.CompilerParams(
            dimension_semantics=("parallel", "parallel"),
            vmem_limit_bytes=VMEM_LIMIT)))


@functools.lru_cache(maxsize=None)
def _gn_stats_call(n, hw, c, ts):
    return jax.jit(pl.pallas_call(
        _gn_stats_kernel,
        out_shape=jax.ShapeDtypeStruct((n, 2, c), jnp.float32),
        grid=(n, hw // ts),
        in_specs=[pl.BlockSpec((1, ts, c), lambda i, s: (i, s, 0))],
        out_specs=pl.BlockSpec((1, 2, c), lambda i, s: (i, 0, 0)),
        compiler_params=pltpu.CompilerParams(
            dimension_semantics=("parallel", "arbitrary"),
            vmem_limit_bytes=VMEM_LIMIT)))


@functools.lru_cache(maxsize=None)
def _gn_apply_call(n, hw, c, ts, apply_swish):
    return jax.jit(pl.pallas_call(
        functools.partial(_gn_apply_kernel, apply_swish=apply_swish),
        out_shape=jax.ShapeDtypeStruct((n, hw, c), jnp.bfloat16),
        grid=(n, hw // ts),
        in_specs=[pl.BlockSpec((1, ts, c), lambda i, s: (i, s, 0)),
                  pl.BlockSpec((1, 1, c), lambda i, s: (i, 0, 0)),
                  pl.BlockSpec((1, 1, c), lambda i, s: (i, 0, 0))],
        out_specs=pl.BlockSpec((1, ts, c), lambda i, s: (i, s, 0)),
        compiler_params=pltpu.CompilerParams(
            dimension_semantics=("parallel", "parallel"),
            vmem_limit_bytes=VMEM_LIMIT)))


@functools.lru_cache(maxsize=None)
def _attn_call(n, t, c):
    return jax.jit(pl.pallas_call(
        _attn_kernel,
        out_shape=jax.ShapeDtypeStruct((n, t, c), jnp.bfloat16),
        grid=(n,),
        in_specs=[pl.BlockSpec((1, t, 3 * c), lambda i: (i, 0, 0))],
        out_specs=pl.BlockSpec((1, t, c), lambda i: (i, 0, 0)),
        compiler_params=pltpu.CompilerParams(
            dimension_semantics=("parallel",), vmem_limit_bytes=VMEM_LIMIT)))


@functools.lru_cache(maxsize=None)
def _codebook_call(m, d, k):
    return jax.jit(pl.pallas_call(
        _codebook_kernel,
        out_shape=(jax.ShapeDtypeStruct((m, d), jnp.bfloat16),
                   jax.ShapeDtypeStruct((m, 1), jnp.int32),
                   jax.ShapeDtypeStruct((1, 1), jnp.float32)),
        grid=(1,),
        in_specs=[pl.BlockSpec((m, d), lambda i: (0, 0)),
                  pl.BlockSpec((k, d), lambda i: (0, 0))],
        out_specs=(pl.BlockSpec((m, d), lambda i: (0, 0)),
                   pl.BlockSpec((m, 1), lambda i: (0, 0)),
                   pl.BlockSpec((1, 1), lambda i: (0, 0))),
        compiler_params=pltpu.CompilerParams(
            dimension_semantics=("arbitrary",), vmem_limit_bytes=VMEM_LIMIT)))


# ----------------------------------------------------------------------------
# Tiling heuristics (VMEM-budget aware, generation aware through VMEM_LIMIT)
# ----------------------------------------------------------------------------
def _largest_divisor_leq(n, cap):
    cap = max(1, min(n, int(cap)))
    for t in range(cap, 0, -1):
        if n % t == 0:
            return t
    return 1


def _pick_th(h, wd, cin, cout):
    cin_e = max(cin, 128)
    cout_e = max(cout, 128)
    # rough per-block estimate: pipelined input + in-kernel copies/acc + output + weights
    fixed = 36 * cin_e * cout_e + 8 * (wd + 2) * cin_e
    per_row = wd * (12 * cin_e + 8 * cout_e)
    cap = max(1, (CONV_VMEM_BUDGET - fixed) // per_row)
    return _largest_divisor_leq(h, cap)


def _pick_ts(hw, c):
    c_e = max(c, 128)
    cap = max(1, GN_VMEM_BUDGET // (12 * c_e))
    return _largest_divisor_leq(hw, cap)


# ----------------------------------------------------------------------------
# Op wrappers
# ----------------------------------------------------------------------------
def matmul_bias(x, w, b):
    m, k = x.shape
    n_out = w.shape[1]
    tm = min(1024, _round_up(m, 8))
    mp = _round_up(m, tm)
    xb = x.astype(jnp.bfloat16)
    if mp != m:
        xb = jnp.pad(xb, ((0, mp - m), (0, 0)))
    out = _matmul_bias_call(mp, k, n_out, tm)(xb, w.astype(jnp.bfloat16),
                                              b.reshape(1, n_out).astype(jnp.float32))
    return out[:m] if mp != m else out


def conv1x1(x, p):
    n, h, w, cin = x.shape
    cout = p["w"].shape[1]
    y = matmul_bias(x.reshape(n * h * w, cin), p["w"], p["b"])
    return y.reshape(n, h, w, cout)


def conv3x3(x, w, b):
    n, h, wd, cin = x.shape
    cout = w.shape[-1]
    xpad = jnp.pad(x.astype(jnp.bfloat16), ((0, 0), (1, 1), (1, 1), (0, 0)))
    th = _pick_th(h, wd, cin, cout)
    f = _conv3x3_call(n, h, wd, cin, cout, th)
    # same padded array passed three times; halo specs fetch the 2 extra rows.
    return f(xpad, xpad, xpad, w.astype(jnp.bfloat16),
             b.reshape(1, cout).astype(jnp.float32))


def group_norm(x, p, apply_swish=False):
    n, h, w, c = x.shape
    hw = h * w
    g = NUM_GROUPS
    cg = c // g
    xr = x.reshape(n, hw, c)
    ts = _pick_ts(hw, c)

    stats = _gn_stats_call(n, hw, c, ts)(xr)               # (n, 2, c) f32
    s1 = stats[:, 0, :].reshape(n, g, cg).sum(axis=2)      # (n, g)
    s2 = stats[:, 1, :].reshape(n, g, cg).sum(axis=2)
    cnt = float(hw * cg)
    mean = s1 / cnt
    var = jnp.maximum(s2 / cnt - mean * mean, 0.0)
    rstd = jax.lax.rsqrt(var + GN_EPS)                     # (n, g)
    rstd_c = jnp.repeat(rstd, cg, axis=1)                  # (n, c)
    mean_c = jnp.repeat(mean, cg, axis=1)
    scale = p["gamma"][None, :] * rstd_c
    shift = p["beta"][None, :] - mean_c * scale
    scale = scale.reshape(n, 1, c).astype(jnp.float32)
    shift = shift.reshape(n, 1, c).astype(jnp.float32)

    out = _gn_apply_call(n, hw, c, ts, bool(apply_swish))(xr, scale, shift)
    return out.reshape(n, h, w, c)


def nonlocal_block(x, p):
    n, h, w, c = x.shape
    t = h * w
    hn = group_norm(x, p["gn"], apply_swish=False)
    qkv = matmul_bias(hn.reshape(n * t, c), p["qkv_w"], p["qkv_b"])     # (n*t, 3c)
    a = _attn_call(n, t, c)(qkv.reshape(n, t, 3 * c))                   # (n, t, c)
    proj = matmul_bias(a.reshape(n * t, c), p["proj"]["w"], p["proj"]["b"])
    return x + proj.reshape(n, h, w, c)


def codebook_apply(z_e, emb, beta):
    n, h, w, d = z_e.shape
    m = n * h * w
    k = emb.shape[0]
    z = z_e.reshape(m, d)
    zq, idx, sq = _codebook_call(m, d, k)(z, emb)
    mse = sq[0, 0] / float(m * d)
    # forward value of: mean((z.detach()-z_q)^2) + beta*mean((z-z_q.detach())^2)
    loss = (1.0 + beta) * mse
    # straight-through z + (z_q - z).detach() == z_q numerically in the forward pass
    return zq.reshape(n, h, w, d), loss, idx.reshape(m)


def upsample2x(x):
    # nearest-neighbour 2x, equivalent to F.interpolate(scale_factor=2.0) (glue)
    return jnp.repeat(jnp.repeat(x, 2, axis=1), 2, axis=2)


# ----------------------------------------------------------------------------
# Parameter construction (deterministic, synthetic)
# ----------------------------------------------------------------------------
def conv3_params(key, cin, cout, scale=0.05):
    kw, kb = jax.random.split(key)
    return {"w": (jax.random.normal(kw, (3, 3, cin, cout), jnp.float32) * scale
                  ).astype(jnp.bfloat16),
            "b": jax.random.normal(kb, (cout,), jnp.float32) * scale}


def conv1_params(key, cin, cout, scale=0.05):
    kw, kb = jax.random.split(key)
    return {"w": (jax.random.normal(kw, (cin, cout), jnp.float32) * scale
                  ).astype(jnp.bfloat16),
            "b": jax.random.normal(kb, (cout,), jnp.float32) * scale}


def gn_params(c):
    return {"gamma": jnp.ones((c,), jnp.float32),
            "beta": jnp.zeros((c,), jnp.float32)}


def res_params(kn, cin, cout):
    p = {"gn1": gn_params(cin),
         "conv1": conv3_params(kn(), cin, cout),
         "gn2": gn_params(cout),
         "conv2": conv3_params(kn(), cout, cout)}
    if cin != cout:
        p["short"] = conv1_params(kn(), cin, cout)
    return p


def attn_params(kn, c):
    q = conv1_params(kn(), c, c)
    k = conv1_params(kn(), c, c)
    v = conv1_params(kn(), c, c)
    return {"gn": gn_params(c),
            "qkv_w": jnp.concatenate([q["w"], k["w"], v["w"]], axis=1),
            "qkv_b": jnp.concatenate([q["b"], k["b"], v["b"]]),
            "proj": conv1_params(kn(), c, c)}


def build_encoder(kn, in_channels, latent_dim):
    channels = [128, 128, 128, 256, 256, 512]
    attn_resolution = [16]
    m = 2
    resolution = 256
    layers = [("conv3", conv3_params(kn(), in_channels, channels[0]))]
    for i in range(len(channels) - 1):
        input_c, output_c = channels[i], channels[i + 1]
        for _ in range(m):
            layers.append(("res", res_params(kn, input_c, output_c)))
            input_c = output_c
            if resolution in attn_resolution:
                layers.append(("attn", attn_params(kn, channels[i + 1])))
        if i < len(channels) - 2:
            layers.append(("up", conv3_params(kn(), channels[i + 1], channels[i + 1])))
            resolution //= 2
    layers.append(("res", res_params(kn, channels[-1], channels[-1])))
    layers.append(("attn", attn_params(kn, channels[-1])))
    layers.append(("res", res_params(kn, channels[-1], channels[-1])))
    layers.append(("gn_swish", gn_params(channels[-1])))
    layers.append(("conv3", conv3_params(kn(), channels[-1], latent_dim)))
    return layers


def build_decoder(kn, latent_dim, out_channels):
    channels = [512, 256, 256, 128, 128, 128]
    attn_resolution = [16]
    resolution = 16
    in_c = channels[0]
    layers = [("conv3", conv3_params(kn(), latent_dim, channels[0])),
              ("res", res_params(kn, channels[0], channels[0])),
              ("attn", attn_params(kn, channels[0])),
              ("res", res_params(kn, channels[0], channels[0]))]
    for i in range(len(channels) - 1):
        out_c = channels[i]
        layers.append(("res", res_params(kn, in_c, out_c)))
        in_c = out_c
        if resolution in attn_resolution:
            layers.append(("attn", attn_params(kn, in_c)))
        if i != 0:
            layers.append(("up", conv3_params(kn(), in_c, in_c)))
            resolution *= 2
    layers.append(("gn_swish", gn_params(in_c)))
    layers.append(("conv3", conv3_params(kn(), in_c, out_channels)))
    return layers


# ----------------------------------------------------------------------------
# Forward pass
# ----------------------------------------------------------------------------
def apply_res(x, p):
    h = group_norm(x, p["gn1"], apply_swish=True)
    h = conv3x3(h, p["conv1"]["w"], p["conv1"]["b"])
    h = group_norm(h, p["gn2"], apply_swish=True)
    h = conv3x3(h, p["conv2"]["w"], p["conv2"]["b"])
    if "short" in p:
        x = conv1x1(x, p["short"])
    return x + h


def apply_layer(x, layer):
    kind, p = layer
    if kind == "conv3":
        return conv3x3(x, p["w"], p["b"])
    if kind == "res":
        return apply_res(x, p)
    if kind == "attn":
        return nonlocal_block(x, p)
    if kind == "up":
        return conv3x3(upsample2x(x), p["w"], p["b"])
    if kind == "gn_swish":
        return group_norm(x, p, apply_swish=True)
    raise ValueError(kind)


def run_layers(x, layers):
    for layer in layers:
        x = apply_layer(x, layer)
    return x


def vqgan_forward(params, x_nchw, beta):
    x = jnp.transpose(x_nchw, (0, 2, 3, 1)).astype(jnp.bfloat16)  # NCHW -> NHWC bf16
    z_e = run_layers(x, params["encoder"])
    z_e = conv1x1(z_e, params["pre_quant"])
    z_q, loss, indices = codebook_apply(z_e, params["codebook"], beta)
    z_q = conv1x1(z_q, params["post_quant"])
    x_recon = run_layers(z_q, params["decoder"])
    x_recon = jnp.transpose(x_recon.astype(jnp.float32), (0, 3, 1, 2))  # back to NCHW
    return x_recon, loss, indices


# ----------------------------------------------------------------------------
if __name__ == "__main__":
    # args (small, deterministic): encoder/decoder channel plans are fixed by the
    # module; batch=1 and a tiny 2x2 input (the architecture as written grows the
    # spatial size 16x in the encoder and another 16x in the decoder).
    in_channels, out_channels, latent_dim, k, beta = 3, 3, 16, 32, 0.25

    root = jax.random.PRNGKey(0)
    _keys = iter(jax.random.split(root, 2048))
    kn = lambda: next(_keys)

    params = {
        "encoder": build_encoder(kn, in_channels, latent_dim),
        "decoder": build_decoder(kn, latent_dim, out_channels),
        "pre_quant": conv1_params(kn(), latent_dim, latent_dim),
        "post_quant": conv1_params(kn(), latent_dim, latent_dim),
        # Codebook embedding ~ U(-1/k, 1/k), as in the PyTorch init
        "codebook": jax.random.uniform(kn(), (k, latent_dim), jnp.float32,
                                       minval=-1.0 / k, maxval=1.0 / k),
    }

    x = jax.random.normal(kn(), (1, in_channels, 2, 2), jnp.float32)   # NCHW input

    x_recon, loss, indices = vqgan_forward(params, x, beta)
    (x_recon, loss, indices) = jax.block_until_ready((x_recon, loss, indices))

    assert x_recon.shape == (1, out_channels, 512, 512), x_recon.shape
    assert indices.shape == (1 * 32 * 32,), indices.shape
    assert indices.dtype == jnp.int32
    assert bool(jnp.isfinite(loss))
    assert bool(jnp.all(jnp.isfinite(x_recon)))

    print("KERNEL_OK")
</pallas_src>

<mosaic_0001>
module attributes {stable_mosaic.version = 11 : i64} {
  func.func @_conv3x3_kernel(%arg0: i32, %arg1: i32, %arg2: memref<1x2x4x3xbf16, #tpu.memory_space<vmem>>, %arg3: memref<1x1x4x3xbf16, #tpu.memory_space<vmem>>, %arg4: memref<1x1x4x3xbf16, #tpu.memory_space<vmem>>, %arg5: memref<3x3x3x128xbf16, #tpu.memory_space<vmem>>, %arg6: memref<1x128xf32, #tpu.memory_space<vmem>>, %arg7: memref<1x2x2x128xbf16, #tpu.memory_space<vmem>>) attributes {dimension_semantics = [#tpu.dimension_semantics<parallel>, #tpu.dimension_semantics<parallel>], iteration_bounds = array<i64: 1, 1>, scalar_prefetch = 0 : i64, scratch_operands = 0 : i64, tpu.core_type = #tpu.core_type<tc>, window_params = [{transform_indices = @transform_0, window_bounds = array<i64: 1, 2, 4, 3>}, {transform_indices = @transform_1, window_bounds = array<i64: 1, 1, 4, 3>}, {transform_indices = @transform_2, window_bounds = array<i64: 1, 1, 4, 3>}, {pipeline_mode = #tpu.pipeline_mode<synchronous>, transform_indices = @transform_3, window_bounds = array<i64: 3, 3, 3, 128>}, {pipeline_mode = #tpu.pipeline_mode<synchronous>, transform_indices = @transform_4, window_bounds = array<i64: 1, 128>}, {transform_indices = @transform_5, window_bounds = array<i64: 1, 2, 2, 128>}]} {
    %c0 = arith.constant 0 : index
    %c0_0 = arith.constant 0 : index
    %c0_1 = arith.constant 0 : index
    %c0_2 = arith.constant 0 : index
    %0 = vector.load %arg2[%c0, %c0_0, %c0_1, %c0_2] : memref<1x2x4x3xbf16, #tpu.memory_space<vmem>>, vector<1x2x4x3xbf16>
    %1 = vector.shape_cast %0 : vector<1x2x4x3xbf16> to vector<2x4x3xbf16>
    %c0_3 = arith.constant 0 : index
    %c0_4 = arith.constant 0 : index
    %c0_5 = arith.constant 0 : index
    %c0_6 = arith.constant 0 : index
    %2 = vector.load %arg3[%c0_3, %c0_4, %c0_5, %c0_6] : memref<1x1x4x3xbf16, #tpu.memory_space<vmem>>, vector<1x1x4x3xbf16>
    %3 = vector.shape_cast %2 : vector<1x1x4x3xbf16> to vector<1x4x3xbf16>
    %c0_7 = arith.constant 0 : index
    %c0_8 = arith.constant 0 : index
    %c0_9 = arith.constant 0 : index
    %c0_10 = arith.constant 0 : index
    %4 = vector.load %arg4[%c0_7, %c0_8, %c0_9, %c0_10] : memref<1x1x4x3xbf16, #tpu.memory_space<vmem>>, vector<1x1x4x3xbf16>
    %5 = vector.shape_cast %4 : vector<1x1x4x3xbf16> to vector<1x4x3xbf16>
    %6 = tpu.concatenate %1, %3, %5 in 0 : vector<2x4x3xbf16>, vector<1x4x3xbf16>, vector<1x4x3xbf16> -> vector<4x4x3xbf16>
    %cst = arith.constant 0.000000e+00 : f32
    %7 = vector.broadcast %cst : f32 to vector<4x128xf32>
    %8 = vector.extract_strided_slice %6 {offsets = [0, 0, 0], sizes = [2, 4, 3], strides = [1, 1, 1]} : vector<4x4x3xbf16> to vector<2x4x3xbf16>
    %9 = vector.extract_strided_slice %8 {offsets = [0, 0, 0], sizes = [2, 2, 3], strides = [1, 1, 1]} : vector<2x4x3xbf16> to vector<2x2x3xbf16>
    %10 = vector.shape_cast %9 : vector<2x2x3xbf16> to vector<4x3xbf16>
    %c0_11 = arith.constant 0 : index
    %c0_12 = arith.constant 0 : index
    %c0_13 = arith.constant 0 : index
    %c0_14 = arith.constant 0 : index
    %11 = vector.load %arg5[%c0_11, %c0_12, %c0_13, %c0_14] : memref<3x3x3x128xbf16, #tpu.memory_space<vmem>>, vector<1x1x3x128xbf16>
    %12 = vector.shape_cast %11 : vector<1x1x3x128xbf16> to vector<3x128xbf16>
    %cst_15 = arith.constant dense<0.000000e+00> : vector<4x128xf32>
    %13 = tpu.matmul %10, %12, %cst_15 {dimension_numbers = #tpu.dot_dimension_numbers<[1], [0], [0], [1], [0, 0, 1, 1], [], []>} : vector<4x3xbf16>, vector<3x128xbf16>, vector<4x128xf32> -> vector<4x128xf32>
    %14 = arith.addf %7, %13 : vector<4x128xf32>
    %15 = vector.extract_strided_slice %8 {offsets = [0, 1, 0], sizes = [2, 2, 3], strides = [1, 1, 1]} : vector<2x4x3xbf16> to vector<2x2x3xbf16>
    %16 = vector.shape_cast %15 : vector<2x2x3xbf16> to vector<4x3xbf16>
    %c0_16 = arith.constant 0 : index
    %c1 = arith.constant 1 : index
    %c0_17 = arith.constant 0 : index
    %c0_18 = arith.constant 0 : index
    %17 = vector.load %arg5[%c0_16, %c1, %c0_17, %c0_18] : memref<3x3x3x128xbf16, #tpu.memory_space<vmem>>, vector<1x1x3x128xbf16>
    %18 = vector.shape_cast %17 : vector<1x1x3x128xbf16> to vector<3x128xbf16>
    %cst_19 = arith.constant dense<0.000000e+00> : vector<4x128xf32>
    %19 = tpu.matmul %16, %18, %cst_19 {dimension_numbers = #tpu.dot_dimension_numbers<[1], [0], [0], [1], [0, 0, 1, 1], [], []>} : vector<4x3xbf16>, vector<3x128xbf16>, vector<4x128xf32> -> vector<4x128xf32>
    %20 = arith.addf %14, %19 : vector<4x128xf32>
    %21 = vector.extract_strided_slice %8 {offsets = [0, 2, 0], sizes = [2, 2, 3], strides = [1, 1, 1]} : vector<2x4x3xbf16> to vector<2x2x3xbf16>
    %22 = vector.shape_cast %21 : vector<2x2x3xbf16> to vector<4x3xbf16>
    %c0_20 = arith.constant 0 : index
    %c2 = arith.constant 2 : index
    %c0_21 = arith.constant 0 : index
    %c0_22 = arith.constant 0 : index
    %23 = vector.load %arg5[%c0_20, %c2, %c0_21, %c0_22] : memref<3x3x3x128xbf16, #tpu.memory_space<vmem>>, vector<1x1x3x128xbf16>
    %24 = vector.shape_cast %23 : vector<1x1x3x128xbf16> to vector<3x128xbf16>
    %cst_23 = arith.constant dense<0.000000e+00> : vector<4x128xf32>
    %25 = tpu.matmul %22, %24, %cst_23 {dimension_numbers = #tpu.dot_dimension_numbers<[1], [0], [0], [1], [0, 0, 1, 1], [], []>} : vector<4x3xbf16>, vector<3x128xbf16>, vector<4x128xf32> -> vector<4x128xf32>
    %26 = arith.addf %20, %25 : vector<4x128xf32>
    %27 = vector.extract_strided_slice %6 {offsets = [1, 0, 0], sizes = [2, 4, 3], strides = [1, 1, 1]} : vector<4x4x3xbf16> to vector<2x4x3xbf16>
    %28 = vector.extract_strided_slice %27 {offsets = [0, 0, 0], sizes = [2, 2, 3], strides = [1, 1, 1]} : vector<2x4x3xbf16> to vector<2x2x3xbf16>
    %29 = vector.shape_cast %28 : vector<2x2x3xbf16> to vector<4x3xbf16>
    %c1_24 = arith.constant 1 : index
    %c0_25 = arith.constant 0 : index
    %c0_26 = arith.constant 0 : index
    %c0_27 = arith.constant 0 : index
    %30 = vector.load %arg5[%c1_24, %c0_25, %c0_26, %c0_27] : memref<3x3x3x128xbf16, #tpu.memory_space<vmem>>, vector<1x1x3x128xbf16>
    %31 = vector.shape_cast %30 : vector<1x1x3x128xbf16> to vector<3x128xbf16>
    %cst_28 = arith.constant dense<0.000000e+00> : vector<4x128xf32>
    %32 = tpu.matmul %29, %31, %cst_28 {dimension_numbers = #tpu.dot_dimension_numbers<[1], [0], [0], [1], [0, 0, 1, 1], [], []>} : vector<4x3xbf16>, vector<3x128xbf16>, vector<4x128xf32> -> vector<4x128xf32>
    %33 = arith.addf %26, %32 : vector<4x128xf32>
    %34 = vector.extract_strided_slice %27 {offsets = [0, 1, 0], sizes = [2, 2, 3], strides = [1, 1, 1]} : vector<2x4x3xbf16> to vector<2x2x3xbf16>
    %35 = vector.shape_cast %34 : vector<2x2x3xbf16> to vector<4x3xbf16>
    %c1_29 = arith.constant 1 : index
    %c1_30 = arith.constant 1 : index
    %c0_31 = arith.constant 0 : index
    %c0_32 = arith.constant 0 : index
    %36 = vector.load %arg5[%c1_29, %c1_30, %c0_31, %c0_32] : memref<3x3x3x128xbf16, #tpu.memory_space<vmem>>, vector<1x1x3x128xbf16>
    %37 = vector.shape_cast %36 : vector<1x1x3x128xbf16> to vector<3x128xbf16>
    %cst_33 = arith.constant dense<0.000000e+00> : vector<4x128xf32>
    %38 = tpu.matmul %35, %37, %cst_33 {dimension_numbers = #tpu.dot_dimension_numbers<[1], [0], [0], [1], [0, 0, 1, 1], [], []>} : vector<4x3xbf16>, vector<3x128xbf16>, vector<4x128xf32> -> vector<4x128xf32>
    %39 = arith.addf %33, %38 : vector<4x128xf32>
    %40 = vector.extract_strided_slice %27 {offsets = [0, 2, 0], sizes = [2, 2, 3], strides = [1, 1, 1]} : vector<2x4x3xbf16> to vector<2x2x3xbf16>
    %41 = vector.shape_cast %40 : vector<2x2x3xbf16> to vector<4x3xbf16>
    %c1_34 = arith.constant 1 : index
    %c2_35 = arith.constant 2 : index
    %c0_36 = arith.constant 0 : index
    %c0_37 = arith.constant 0 : index
    %42 = vector.load %arg5[%c1_34, %c2_35, %c0_36, %c0_37] : memref<3x3x3x128xbf16, #tpu.memory_space<vmem>>, vector<1x1x3x128xbf16>
    %43 = vector.shape_cast %42 : vector<1x1x3x128xbf16> to vector<3x128xbf16>
    %cst_38 = arith.constant dense<0.000000e+00> : vector<4x128xf32>
    %44 = tpu.matmul %41, %43, %cst_38 {dimension_numbers = #tpu.dot_dimension_numbers<[1], [0], [0], [1], [0, 0, 1, 1], [], []>} : vector<4x3xbf16>, vector<3x128xbf16>, vector<4x128xf32> -> vector<4x128xf32>
    %45 = arith.addf %39, %44 : vector<4x128xf32>
    %46 = vector.extract_strided_slice %6 {offsets = [2, 0, 0], sizes = [2, 4, 3], strides = [1, 1, 1]} : vector<4x4x3xbf16> to vector<2x4x3xbf16>
    %47 = vector.extract_strided_slice %46 {offsets = [0, 0, 0], sizes = [2, 2, 3], strides = [1, 1, 1]} : vector<2x4x3xbf16> to vector<2x2x3xbf16>
    %48 = vector.shape_cast %47 : vector<2x2x3xbf16> to vector<4x3xbf16>
    %c2_39 = arith.constant 2 : index
    %c0_40 = arith.constant 0 : index
    %c0_41 = arith.constant 0 : index
    %c0_42 = arith.constant 0 : index
    %49 = vector.load %arg5[%c2_39, %c0_40, %c0_41, %c0_42] : memref<3x3x3x128xbf16, #tpu.memory_space<vmem>>, vector<1x1x3x128xbf16>
    %50 = vector.shape_cast %49 : vector<1x1x3x128xbf16> to vector<3x128xbf16>
    %cst_43 = arith.constant dense<0.000000e+00> : vector<4x128xf32>
    %51 = tpu.matmul %48, %50, %cst_43 {dimension_numbers = #tpu.dot_dimension_numbers<[1], [0], [0], [1], [0, 0, 1, 1], [], []>} : vector<4x3xbf16>, vector<3x128xbf16>, vector<4x128xf32> -> vector<4x128xf32>
    %52 = arith.addf %45, %51 : vector<4x128xf32>
    %53 = vector.extract_strided_slice %46 {offsets = [0, 1, 0], sizes = [2, 2, 3], strides = [1, 1, 1]} : vector<2x4x3xbf16> to vector<2x2x3xbf16>
    %54 = vector.shape_cast %53 : vector<2x2x3xbf16> to vector<4x3xbf16>
    %c2_44 = arith.constant 2 : index
    %c1_45 = arith.constant 1 : index
    %c0_46 = arith.constant 0 : index
    %c0_47 = arith.constant 0 : index
    %55 = vector.load %arg5[%c2_44, %c1_45, %c0_46, %c0_47] : memref<3x3x3x128xbf16, #tpu.memory_space<vmem>>, vector<1x1x3x128xbf16>
    %56 = vector.shape_cast %55 : vector<1x1x3x128xbf16> to vector<3x128xbf16>
    %cst_48 = arith.constant dense<0.000000e+00> : vector<4x128xf32>
    %57 = tpu.matmul %54, %56, %cst_48 {dimension_numbers = #tpu.dot_dimension_numbers<[1], [0], [0], [1], [0, 0, 1, 1], [], []>} : vector<4x3xbf16>, vector<3x128xbf16>, vector<4x128xf32> -> vector<4x128xf32>
    %58 = arith.addf %52, %57 : vector<4x128xf32>
    %59 = vector.extract_strided_slice %46 {offsets = [0, 2, 0], sizes = [2, 2, 3], strides = [1, 1, 1]} : vector<2x4x3xbf16> to vector<2x2x3xbf16>
    %60 = vector.shape_cast %59 : vector<2x2x3xbf16> to vector<4x3xbf16>
    %c2_49 = arith.constant 2 : index
    %c2_50 = arith.constant 2 : index
    %c0_51 = arith.constant 0 : index
    %c0_52 = arith.constant 0 : index
    %61 = vector.load %arg5[%c2_49, %c2_50, %c0_51, %c0_52] : memref<3x3x3x128xbf16, #tpu.memory_space<vmem>>, vector<1x1x3x128xbf16>
    %62 = vector.shape_cast %61 : vector<1x1x3x128xbf16> to vector<3x128xbf16>
    %cst_53 = arith.constant dense<0.000000e+00> : vector<4x128xf32>
    %63 = tpu.matmul %60, %62, %cst_53 {dimension_numbers = #tpu.dot_dimension_numbers<[1], [0], [0], [1], [0, 0, 1, 1], [], []>} : vector<4x3xbf16>, vector<3x128xbf16>, vector<4x128xf32> -> vector<4x128xf32>
    %64 = arith.addf %58, %63 : vector<4x128xf32>
    %c0_54 = arith.constant 0 : index
    %c0_55 = arith.constant 0 : index
    %65 = vector.load %arg6[%c0_54, %c0_55] : memref<1x128xf32, #tpu.memory_space<vmem>>, vector<1x128xf32>
    %66 = vector.broadcast %65 : vector<1x128xf32> to vector<4x128xf32>
    %67 = arith.addf %64, %66 : vector<4x128xf32>
    %68 = arith.truncf %67 : vector<4x128xf32> to vector<4x128xbf16>
    %69 = vector.shape_cast %68 : vector<4x128xbf16> to vector<1x2x2x128xbf16>
    %c0_56 = arith.constant 0 : index
    %c0_57 = arith.constant 0 : index
    %c0_58 = arith.constant 0 : index
    %c0_59 = arith.constant 0 : index
    %70 = vector.load %arg7[%c0_56, %c0_57, %c0_58, %c0_59] : memref<1x2x2x128xbf16, #tpu.memory_space<vmem>>, vector<1x2x2x128xbf16>
    tpu.vector_store %arg7[%c0_56, %c0_57, %c0_58, %c0_59], %69 {strides = array<i32>} : memref<1x2x2x128xbf16, #tpu.memory_space<vmem>>, vector<1x2x2x128xbf16>,
    return
  }
  func.func @transform_0(%arg0: i32, %arg1: i32) -> (i32, i32, i32, i32) {
    %c0_i32 = arith.constant 0 : i32
    %c0_i32_0 = arith.constant 0 : i32
    %c0_i32_1 = arith.constant 0 : i32
    return %arg0, %arg1, %c0_i32, %c0_i32_0 : i32, i32, i32, i32
  }
  func.func @transform_1(%arg0: i32, %arg1: i32) -> (i32, i32, i32, i32) {
    %c2_i32 = arith.constant 2 : i32
    %0 = arith.muli %arg1, %c2_i32 : i32
    %c2_i32_0 = arith.constant 2 : i32
    %1 = arith.addi %0, %c2_i32_0 : i32
    %c0_i32 = arith.constant 0 : i32
    %c0_i32_1 = arith.constant 0 : i32
    %c0_i32_2 = arith.constant 0 : i32
    return %arg0, %1, %c0_i32, %c0_i32_1 : i32, i32, i32, i32
  }
  func.func @transform_2(%arg0: i32, %arg1: i32) -> (i32, i32, i32, i32) {
    %c2_i32 = arith.constant 2 : i32
    %0 = arith.muli %arg1, %c2_i32 : i32
    %c2_i32_0 = arith.constant 2 : i32
    %1 = arith.addi %0, %c2_i32_0 : i32
    %c1_i32 = arith.constant 1 : i32
    %2 = arith.addi %1, %c1_i32 : i32
    %c0_i32 = arith.constant 0 : i32
    %c0_i32_1 = arith.constant 0 : i32
    %c0_i32_2 = arith.constant 0 : i32
    return %arg0, %2, %c0_i32, %c0_i32_1 : i32, i32, i32, i32
  }
  func.func @transform_3(%arg0: i32, %arg1: i32) -> (i32, i32, i32, i32) {
    %c0_i32 = arith.constant 0 : i32
    %c0_i32_0 = arith.constant 0 : i32
    %c0_i32_1 = arith.constant 0 : i32
    %c0_i32_2 = arith.constant 0 : i32
    %c0_i32_3 = arith.constant 0 : i32
    return %c0_i32, %c0_i32_0, %c0_i32_1, %c0_i32_2 : i32, i32, i32, i32
  }
  func.func @transform_4(%arg0: i32, %arg1: i32) -> (i32, i32) {
    %c0_i32 = arith.constant 0 : i32
    %c0_i32_0 = arith.constant 0 : i32
    %c0_i32_1 = arith.constant 0 : i32
    return %c0_i32, %c0_i32_0 : i32, i32
  }
  func.func @transform_5(%arg0: i32, %arg1: i32) -> (i32, i32, i32, i32) {
    %c0_i32 = arith.constant 0 : i32
    %c0_i32_0 = arith.constant 0 : i32
    %c0_i32_1 = arith.constant 0 : i32
    return %arg0, %arg1, %c0_i32, %c0_i32_0 : i32, i32, i32, i32
  }
}

</mosaic_0001>

<bundles_post_ra>
// kernel: tpu_custom_call.1
= control target key start
LH: loop header
LB: loop body
LE: loop exit
PB: predicated region body
PF: predicated region fallthrough
CT: control target
= control target key end

     0   :  { %vm143_vm0 = vcmask 1040384   ;;  %vm144_vm1 = vcmask 1041408   ;;  %v931_v1 = vmov 0.0   ;;  %v932_v2 = vmov 65535   ;;  %s1128_s0 = inlined_call_operand.vmem [shape: bf16[1,4,4,3], index: 0, kind: input, shape index: {}]   ;;  %s1129_s1 = inlined_call_operand.vmem [shape: bf16[1,4,4,3], index: 1, kind: input, shape index: {}]   ;;  %s1130_s2 = inlined_call_operand.vmem [shape: bf16[1,4,4,3], index: 2, kind: input, shape index: {}]   ;;  %s1131_s3 = inlined_call_operand.vmem [shape: bf16[3,3,3,128], index: 3, kind: input, shape index: {}]   ;;  %s1132_s4 = inlined_call_operand.vmem [shape: f32[1,128], index: 4, kind: input, shape index: {}]   ;;  %s1133_s5 = inlined_call_operand.hbm [shape: bf16[1,2,2,128], index: 5, kind: output, shape index: {}]  }
   0x1   :  { %v803_v0 = vld [vmem:[%s1131_s3 + $0x2] sm:$0x3]  ;;  %846 = vmatprep.subr.bf16.mxu0 %v931_v1  ;;  %v145_v3 = vsel %vm143_vm0, 4294967295, %v932_v2  ;;  %852 = vmatprep.subr.bf16.mxu1 %v931_v1  ;;  %v70_v4 = vld [vmem:[%s1131_s3] sm:$0x3]  ;;  %v76_v5 = vlaneseq  ;;  %vm933_vm2 = vmmov 0  }
   0x2   :  { %v976_v6 = vsel %vm144_vm1, %v145_v3, 0  ;;  %848 = vmatprep.mubr.msk.bf16.mxu0 %vm933_vm2, %v931_v1  ;;  %854 = vmatprep.mubr.msk.bf16.mxu1 %vm933_vm2, %v931_v1  ;;  %v934_v10 = vmov 1966171168   ;;  %vm89_vm3 = vsmask.f32 256 }
   0x3   :  { %v148_v7 = vand.u32 %v803_v0, %v976_v6  ;;  %v209_v8 = vand.u32 %v976_v6, %v70_v4  ;;  %v77_v9 = vshrl.u32 %v76_v5, 7  ;;  %v74_v11 = vunpack.c.l.s4 %v934_v10  ;;  %v66_v12 = vld [vmem:[%s1128_s0] sm:$0x3]  ;;  %v67_v13 = vld [vmem:[%s1128_s0 + $0x2] sm:$0x3] }
   0x4   :  { %vm90_vm4 = vsmask.f32 1284  ;;  %vm92_vm5 = vsmask.f32 2312  ;;  %vm94_vm7 = vsmask.f32 3340  ;;  %v190_v15 = vcombine.low %v66_v12, %v67_v13 }
   0x5   :  { %847 = vmatpush3.bf16.msra.mxu0 %v148_v7  ;;  %853 = vmatpush3.bf16.msra.mxu1 %v209_v8  ;;  %vm91_vm6 = vmor %vm89_vm3, %vm90_vm4  ;;  %vm96_vm8 = vsmask.f32 4368  ;;  %v75_v14 = vunpack.c.0.s8 %v74_v11  ;;  %vm98_vm10 = vsmask.f32 5396  ;;  %vm100_vm12 = vsmask.f32 6424 }
   0x6   :  { %858 = vmatprep.subr.bf16.mxu0 %v931_v1  ;;  %vm93_vm9 = vmor %vm91_vm6, %vm92_vm5  ;;  %864 = vmatprep.subr.bf16.mxu1 %v931_v1  ;;  %v995_v16 = vld [vmem:[%s1129_s1 + $0x4] sm:$0x3]  ;;  %vm102_vm0 = vsmask.f32 7452  ;;  %v809_v20 = vld [vmem:[%s1131_s3 + $0x6] sm:$0x3] }
   0x7   :  { %vm95_vm11 = vmor %vm93_vm9, %vm94_vm7  ;;  %v997_v17 = vsub.s32 %v75_v14, %v77_v9  ;;  %v1007_v21 = vld [vmem:[%s1130_s2 + $0x6] sm:$0x3] }
   0x8   :  { %vm97_vm13 = vmor %vm95_vm11, %vm96_vm8 }
   0x9   :  { %vm99_vm14 = vmor %vm97_vm13, %vm98_vm10  ;;  %v79_v18 = vrot.slane %v66_v12, %v997_v17  ;;  %v87_v19 = vrot.slane %v67_v13, %v997_v17  ;;  %v1011_v22 = vrot.slane %v995_v16, %v997_v17  ;;  %v197_v23 = vrot.slane %v190_v15, %v997_v17 }
   0xa   :  { %vm101_vm15 = vmor %vm99_vm14, %vm100_vm12 }
   0xb   :  { %v80_v24 = vcombine.high %v79_v18, %v79_v18  ;;  %v88_v25 = vcombine.high %v87_v19, %v87_v19  ;;  %v105_v26 = vshrl.u32 %v79_v18, 16  ;;  %v114_v27 = vshrl.u32 %v87_v19, 16 }
   0xc   :  { %10 = vsyncpa [#allocation3], 0  ;;  %vm139_vm3 = vcmask 23552   ;;  %v337_v29 = vand.u32 %v809_v20, %v976_v6  ;;  %v318_v30 = vcombine.low %v67_v13, %v995_v16  ;;  %v1022_v33 = vrot.slane %v1007_v21, %v997_v17  ;;  %v806_v39 = vld [vmem:[%s1131_s3 + $0x4] sm:$0x3]  ;;  %s935_s17 = smov [#allocation2]  }
   0xd   :  { %vm1014_vm1 = vmor %vm101_vm15, %vm102_vm0  ;;  %v110_v31 = vshll.u32 %v80_v24, 16  ;;  %v119_v32 = vshll.u32 %v88_v25, 16  ;;  %v204_v34 = vrot.slane %v197_v23, %v997_v17  ;;  %v387_v37 = vcombine.high %v1011_v22, %v1011_v22  ;;  %v814_v44 = vld [vmem:[%s1131_s3 + $0xa] sm:$0x3]  ;;  %v812_v56 = vld [vmem:[%s1131_s3 + $0x8] sm:$0x3] }
   0xe   :  { %v325_v40 = vrot.slane %v318_v30, %v997_v17  ;;  %v597_v41 = vcombine.high %v1022_v33, %v1022_v33  ;;  %v807_v43 = vcombine.high %v79_v18, %v87_v19  ;;  %v389_v45 = vshrl.u32 %v1011_v22, 16  ;;  %v820_v61 = vld [vmem:[%s1131_s3 + $0xe] sm:$0x3]  ;;  %v817_v4 = vld [vmem:[%s1131_s3 + $0xc] sm:$0x3]  ;;  %s776_s18 = sshll.u32 %s935_s17, 4  ;;  %s777_s18 = int_to_ptr.vmem [resolvable:$true] %s776_s18 }
   0xf   :  { %v112_v35 = vsel %vm1014_vm1, %v105_v26, %v110_v31  ;;  %v121_v36 = vsel %vm1014_vm1, %v114_v27, %v119_v32  ;;  %855 = vmatmul.mubr.msk.bf16.vlgmr.msra.gmra.mrb[0].mxu1 %vm139_vm3, %v204_v34  ;;  %v394_v46 = vshll.u32 %v387_v37, 16  ;;  %v272_v47 = vand.u32 %v806_v39, %v976_v6  ;;  %v822_v12 = vld [vmem:[%s1131_s3 + $0x10] sm:$0x3]  ;;  %s907_s19 = scalar_lea.vmem %s777_s18, 32  ;;  %p912_p1 = scmp.lt.s32.totalorder %s777_s18, %s777_s18 }
  0x10   :  { %v124_v38 = vcombine.low %v112_v35, %v121_v36  ;;  %865 = vmatpush3.bf16.msra.mxu1 %v337_v29  ;;  %866 = vmatprep.mubr.msk.bf16.mxu1 %vm933_vm2, %v931_v1  ;;  %v332_v49 = vrot.slane %v325_v40, %v997_v17  ;;  %v815_v50 = vcombine.high %v87_v19, %v1011_v22  ;;  %v599_v51 = vshrl.u32 %v1022_v33, 16  ;;  %p908_p0 = scmp.ne.s32.totalorder %s777_s18, %s907_s19  ;;  %p913_p2 = scmp.lt.s32.totalorder %s907_s19, %s907_s19 }
  0x11   :  { %876 = vmatprep.subr.bf16.mxu1 %v931_v1  ;;  %v604_v52 = vshll.u32 %v597_v41, 16  ;;  %v482_v53 = vand.u32 %v814_v44, %v976_v6  ;;  %v260_v54 = vrot.slane %v807_v43, %v997_v17  ;;  %v396_v55 = vsel %vm1014_vm1, %v389_v45, %v394_v46 }
  0x12   :  { %v131_v42 = vrot.slane %v124_v38, %v997_v17  ;;  %v470_v57 = vrot.slane %v815_v50, %v997_v17  ;;  %v399_v59 = vcombine.low %v121_v36, %v396_v55  ;;  %v418_v62 = vand.u32 %v812_v56, %v976_v6  ;;  %p914_p3 = por %p913_p2, %p912_p1 }
  0x13   :  { %v606_v58 = vsel %vm1014_vm1, %v599_v51, %v604_v52  ;;  %v267_v60 = vrot.slane %v260_v54, %v997_v17  ;;  %v628_v2 = vand.u32 %v820_v61, %v976_v6  ;;  %v528_v8 = vcombine.low %v995_v16, %v1007_v21 }
  0x14   :  { %v138_v48 = vrot.slane %v131_v42, %v997_v17  ;;  %v609_v63 = vcombine.low %v396_v55, %v606_v58  ;;  %v477_v0 = vrot.slane %v470_v57, %v997_v17  ;;  %v406_v3 = vrot.slane %v399_v59, %v997_v17  ;;  %v825_v57 = vld [vmem:[%s1132_s4] ss:$0 sm:$0xff]  ;;  %p915_p4 = pnand %p914_p3, %p908_p0 }
  0x15   :  { %v547_v9 = vand.u32 %v817_v4, %v976_v6  ;;  %v535_v11 = vrot.slane %v528_v8, %v997_v17  ;;  %v823_v14 = vcombine.high %v1011_v22, %v1022_v33  ;;  %v692_v15 = vand.u32 %v822_v12, %v976_v6 }
  0x16   :  { %849 = vmatmul.mubr.msk.bf16.vlgmr.msra.gmra.mrb[0].mxu0 %vm139_vm3, %v138_v48  ;;  %v616_v5 = vrot.slane %v609_v63, %v997_v17  ;;  %v413_v7 = vrot.slane %v406_v3, %v997_v17 }
  0x17   :  { %859 = vmatpush3.bf16.msra.mxu0 %v272_v47  ;;  %860 = vmatprep.mubr.msk.bf16.mxu0 %vm933_vm2, %v931_v1  ;;  %v542_v13 = vrot.slane %v535_v11, %v997_v17  ;;  %v680_v16 = vrot.slane %v823_v14, %v997_v17 }
  0x18   :  { %870 = vmatprep.subr.bf16.mxu0 %v931_v1  ;;  %867 = vmatmul.mubr.msk.bf16.vlgmr.msra.gmra.mrb[4].mxu1 %vm139_vm3, %v332_v49  ;;  %v623_v10 = vrot.slane %v616_v5, %v997_v17 }
  0x19   :  { %877 = vmatpush3.bf16.msra.mxu1 %v482_v53  ;;  %878 = vmatprep.mubr.msk.bf16.mxu1 %vm933_vm2, %v931_v1  ;;  %v687_v18 = vrot.slane %v680_v16, %v997_v17 }
  0x1a   :  { %888 = vmatprep.subr.bf16.mxu1 %v931_v1 }
  0x1e   :  { %861 = vmatmul.mubr.msk.bf16.vlgmr.msra.gmra.mrb[4].mxu0 %vm139_vm3, %v267_v60 }
  0x1f   :  { %871 = vmatpush3.bf16.msra.mxu0 %v418_v62  ;;  %872 = vmatprep.mubr.msk.bf16.mxu0 %vm933_vm2, %v931_v1 }
  0x20   :  { %882 = vmatprep.subr.bf16.mxu0 %v931_v1  ;;  %879 = vmatmul.mubr.msk.bf16.vlgmr.msra.gmra.mrb[8].mxu1 %vm139_vm3, %v477_v0 }
  0x21   :  { %889 = vmatpush3.bf16.msra.mxu1 %v628_v2  ;;  %890 = vmatprep.mubr.msk.bf16.mxu1 %vm933_vm2, %v931_v1 }
  0x26   :  { %873 = vmatmul.mubr.msk.bf16.vlgmr.msra.gmra.mrb[8].mxu0 %vm139_vm3, %v413_v7 }
  0x27   :  { %883 = vmatpush3.bf16.msra.mxu0 %v547_v9  ;;  %884 = vmatprep.mubr.msk.bf16.mxu0 %vm933_vm2, %v931_v1 }
  0x28   :  { %894 = vmatprep.subr.bf16.mxu0 %v931_v1  ;;  %891 = vmatmul.mubr.msk.bf16.vlgmr.msra.gmra.mrb[12].mxu1 %vm139_vm3, %v623_v10 }
  0x2e   :  { %885 = vmatmul.mubr.msk.bf16.vlgmr.msra.gmra.mrb[12].mxu0 %vm139_vm3, %v542_v13 }
  0x2f   :  { %895 = vmatpush3.bf16.msra.mxu0 %v692_v15  ;;  %896 = vmatprep.mubr.msk.bf16.mxu0 %vm933_vm2, %v931_v1 }
  0x36   :  { %897 = vmatmul.mubr.msk.bf16.vlgmr.msra.gmra.mrb[16].mxu0 %vm139_vm3, %v687_v18 }
  0xe2   :  { %v245_v19 = vpop.f32.mrb[0].mxu1 }
  0xe3   :  { %v856_v20 = vpop.f32.mrb[1].mxu1 }
  0xe4   :  { %v248_v21 = vpop.f32.mrb[2].mxu1 }
  0xe5   :  { %v857_v23 = vpop.f32.mrb[3].mxu1 }
  0xe9   :  { %v184_v24 = vpop.f32.mrb[0].mxu0 }
  0xea   :  { %v246_v22 = vadd.f32 %v245_v19, %v184_v24  ;;  %v850_v25 = vpop.f32.mrb[1].mxu0 }
  0xeb   :  { %v187_v6 = vpop.f32.mrb[2].mxu0  ;;  %v373_v26 = vpop.f32.mrb[4].mxu1 }
  0xec   :  { %v851_v27 = vpop.f32.mrb[3].mxu0  ;;  %v868_v28 = vpop.f32.mrb[5].mxu1 }
  0xed   :  { %v376_v29 = vpop.f32.mrb[6].mxu1 }
  0xee   :  { %v869_v30 = vpop.f32.mrb[7].mxu1 }
  0xf1   :  { %v308_v31 = vpop.f32.mrb[4].mxu0 }
  0xf2   :  { %v314_v32 = vadd.f32 %v308_v31, %v246_v22  ;;  %v862_v1 = vpop.f32.mrb[5].mxu0 }
  0xf3   :  { %v311_v33 = vpop.f32.mrb[6].mxu0  ;;  %v518_v34 = vpop.f32.mrb[8].mxu1 }
  0xf4   :  { %v379_v35 = vadd.f32 %v373_v26, %v314_v32  ;;  %v863_v36 = vpop.f32.mrb[7].mxu0  ;;  %v880_v37 = vpop.f32.mrb[9].mxu1 }
  0xf5   :  { %v521_v38 = vpop.f32.mrb[10].mxu1 }
  0xf6   :  { %v881_v39 = vpop.f32.mrb[11].mxu1 }
  0xf9   :  { %v454_v40 = vpop.f32.mrb[8].mxu0 }
  0xfa   :  { %v460_v41 = vadd.f32 %v454_v40, %v379_v35  ;;  %v874_v42 = vpop.f32.mrb[9].mxu0 }
  0xfb   :  { %v457_v43 = vpop.f32.mrb[10].mxu0  ;;  %v664_v44 = vpop.f32.mrb[12].mxu1 }
  0xfc   :  { %v524_v45 = vadd.f32 %v518_v34, %v460_v41  ;;  %v875_v46 = vpop.f32.mrb[11].mxu0  ;;  %v892_v47 = vpop.f32.mrb[13].mxu1 }
  0xfd   :  { %v667_v48 = vpop.f32.mrb[14].mxu1 }
  0xfe   :  { %v893_v49 = vpop.f32.mrb[15].mxu1 }
 0x101   :  { %v583_v50 = vpop.f32.mrb[12].mxu0 }
 0x102   :  { %v589_v51 = vadd.f32 %v583_v50, %v524_v45  ;;  %v886_v52 = vpop.f32.mrb[13].mxu0 }
 0x103   :  { %v586_v53 = vpop.f32.mrb[14].mxu0 }
 0x104   :  { %v670_v54 = vadd.f32 %v664_v44, %v589_v51  ;;  %v887_v55 = vpop.f32.mrb[15].mxu0 }
 0x109   :  { %v728_v56 = vpop.f32.mrb[16].mxu0 }
 0x10a   :  { %v734_v58 = vadd.f32 %v728_v56, %v670_v54  ;;  %v898_v59 = vpop.f32.mrb[17].mxu0 }
 0x10b   :  { %v731_v60 = vpop.f32.mrb[18].mxu0 }
 0x10c   :  { %v742_v61 = vadd.f32 %v825_v57, %v734_v58  ;;  %v899_v62 = vpop.f32.mrb[19].mxu0 }
 0x10e   :  { %v743_v63 = vpack.c.bf16 %v742_v61, %v742_v61 }
 0x110   :  { %v751_v0 = vrot.slane %v743_v63, %v997_v17 }
 0x112   :  { %v752_v2 = vcombine.high %v751_v0, %v751_v0  ;;  %826 = vst.sshfl [vmem:[#allocation2] sm:$0x1 pattern:$0x73625140] %v751_v0 }
 0x114   :  { %827 = vst.sshfl [vmem:[#allocation2 + $0x1] sm:$0x1 pattern:$0x73625140] %v752_v2 }
 0x115   :  { %918 = shalt.err (!%p915_p4)
}
 0x116   :  { %s919_s21 = scalar_lea.hbm %s1133_s5, 32 }
 0x117   :  { %p920_p5 = scmp.ne.s32.totalorder %s1133_s5, %s919_s21  ;;  %p923_p6 = scmp.lt.u32.totalorder %s919_s21, %s1133_s5 }
 0x119   :  { %p925_p7 = pnand %p923_p6, %p920_p5 }
 0x11b   :  { %928 = shalt.err (!%p925_p7)
}
 0x11c   :  { %s936_s26 = smov 16   ;;  %s937_s27 = smov 1  }
 0x11d   :  { %782 = dma.vmem_to_hbm [thread:$0]  %s777_s18, 32, %s1133_s5, [#allocation3], %s936_s26, %s936_s26, %s937_s27  }
 0x11e   :  { %929 = dma.done.wait [#allocation3], 32  }
 0x11f   :  { %930 = vsyncadd [#allocation3], 4294967264 }
 0x120   :  { %786 = vsyncpa [#allocation3], 1 }

</bundles_post_ra>
